<compile_context>
chip_gen: v7x
topology: tpu7x:2x2x1
jax: 0.10.0
libtpu: 0.0.40
codegen_flags: <defaults>
</compile_context>

<pallas_src>
import functools

import jax
import jax.numpy as jnp
from jax.experimental import pallas as pl
from jax.experimental.pallas import tpu as pltpu


_LANE = 128
# Budget for the double-buffered x-input + x-output blocks.  12 MiB keeps the
# kernel under v5e's 16 MiB scoped-VMEM default (v6e: 32 MiB, v7x: 32 MiB scoped /
# 64 MiB physical), so we never need to touch vmem_limit_bytes.
_VMEM_PIPELINE_BUDGET = 12 * 1024 * 1024


def _round_up(x, m):
    return ((x + m - 1) // m) * m


def _choose_row_tile(n_rows, n_cols, itemsize):
    """Row-tile (sublane) size for the x / out blocks.

    * multiple of 8 (16 for 2-byte dtypes) -> legal (8,128)/(16,128) tiling
    * 2 pipeline buffers x (in-block + out-block) stay under _VMEM_PIPELINE_BUDGET
    * keep >= 4 grid steps for large inputs (v7x megacore sharding + DMA overlap)
    """
    align = 16 if itemsize < 4 else 8
    per_row_bytes = 4 * n_cols * itemsize            # 2 bufs x (in + out)
    tn = max(align, (_VMEM_PIPELINE_BUDGET // per_row_bytes) // align * align)
    if n_rows >= 4 * align:
        tn = min(tn, max(align, (n_rows // 4) // align * align))
    tn = min(tn, _round_up(n_rows, align))
    return tn


# ----------------------------- kernels --------------------------------------

def _bitparm_kernel(x_ref, p_ref, o_ref):
    # p_ref rows: 0 = softplus(h), 1 = b, 2 = tanh(a)  (hoisted in the wrapper)
    x = x_ref[...].astype(jnp.float32)
    p = p_ref[...]
    sp, b, ta = p[0:1, :], p[1:2, :], p[2:3, :]
    xt = x * sp + b
    o_ref[...] = (xt + jnp.tanh(xt) * ta).astype(o_ref.dtype)


def _bitparm_final_kernel(x_ref, p_ref, o_ref):
    # p_ref rows: 0 = softplus(h), 1 = b
    x = x_ref[...].astype(jnp.float32)
    p = p_ref[...]
    sp, b = p[0:1, :], p[1:2, :]
    z = x * sp + b
    # sigmoid(z) = 0.5 * tanh(0.5 * z) + 0.5 -> one EUP tanh, no VALU divide.
    o_ref[...] = (0.5 * jnp.tanh(0.5 * z) + 0.5).astype(o_ref.dtype)


def _bitestimator_kernel(x_ref, p_ref, o_ref, *, num_layers):
    """Fused stack: (num_layers-1) non-final Bitparm layers + 1 final layer.
    x stays resident in VMEM for the whole chain (one HBM read + one write)."""
    x = x_ref[...].astype(jnp.float32)
    p = p_ref[...]                      # (3 * num_layers, C); final layer row 2 unused
    for l in range(num_layers - 1):
        sp = p[3 * l:3 * l + 1, :]
        b = p[3 * l + 1:3 * l + 2, :]
        ta = p[3 * l + 2:3 * l + 3, :]
        x = x * sp + b
        x = x + jnp.tanh(x) * ta
    l = num_layers - 1
    sp = p[3 * l:3 * l + 1, :]
    b = p[3 * l + 1:3 * l + 2, :]
    z = x * sp + b
    o_ref[...] = (0.5 * jnp.tanh(0.5 * z) + 0.5).astype(o_ref.dtype)


# ----------------------------- driver ---------------------------------------

def _run_elementwise(kernel, x, packed_params):
    """Launch a per-channel elementwise kernel on x:(N,C) with a small packed
    (P, C) parameter array kept resident in VMEM across the grid."""
    N, C = x.shape
    itemsize = jnp.dtype(x.dtype).itemsize

    C_pad = _round_up(C, _LANE)
    if C_pad != C:
        # Pad channels so output stores stay lane-dense (unmasked full-lane vst);
        # padded lanes are sliced off below.
        x = jnp.pad(x, ((0, 0), (0, C_pad - C)))
        packed_params = jnp.pad(packed_params, ((0, 0), (0, C_pad - C)))

    tn = _choose_row_tile(N, C_pad, itemsize)
    grid = (pl.cdiv(N, tn),)            # ragged last row-block handled by Pallas
    P = packed_params.shape[0]

    x_spec = pl.BlockSpec((tn, C_pad), lambda i: (i, 0))
    p_spec = pl.BlockSpec((P, C_pad), lambda i: (0, 0))   # constant block -> resident

    out = pl.pallas_call(
        kernel,
        out_shape=jax.ShapeDtypeStruct((N, C_pad), x.dtype),
        grid_spec=pltpu.PrefetchScalarGridSpec(
            num_scalar_prefetch=0,
            grid=grid,
            in_specs=[x_spec, p_spec],
            out_specs=x_spec,
        ),
        compiler_params=pltpu.CompilerParams(
            # Independent row blocks -> shards across both v7x TensorCores.
            dimension_semantics=("parallel",),
        ),
    )(x, packed_params)

    if C_pad != C:
        out = out[:, :C]
    return out


# ----------------------------- modules --------------------------------------

class BitparmPallas:
    """JAX/Pallas re-implementation of Bitparm (deterministic synthetic init)."""

    def __init__(self, channel, key, is_symmetric=False, is_unimodal=False,
                 final=False):
        self.final = final
        self.is_unimodal = is_unimodal
        self.channel = channel
        k_h, k_b, k_a = jax.random.split(key, 3)
        # torch.nn.init.normal_(..., 0, 0.01) equivalents, shape (1, channel)
        self.h = (0.01 * jax.random.normal(k_h, (1, channel))).astype(jnp.float32)
        if is_symmetric:
            self.b = jnp.zeros((1, channel), jnp.float32)
        else:
            self.b = (0.01 * jax.random.normal(k_b, (1, channel))).astype(jnp.float32)
        self.a = (None if final
                  else (0.01 * jax.random.normal(k_a, (1, channel))).astype(jnp.float32))
        # Hoisted grid-invariant parameter transcendentals, packed into one array.
        self._packed = self._pack_params()

    def _pack_params(self):
        sp = jax.nn.softplus(self.h)
        if self.final:
            return jnp.concatenate([sp, self.b], axis=0)            # (2, C)
        a = jnp.abs(self.a) if self.is_unimodal else self.a
        return jnp.concatenate([sp, self.b, jnp.tanh(a)], axis=0)   # (3, C)

    def __call__(self, x, single_channel=None):
        # TODO(synk): single_channel (per-channel scalar broadcast) path not implemented.
        assert single_channel is None
        N, C = x.shape
        assert C == self.channel
        kernel = _bitparm_final_kernel if self.final else _bitparm_kernel
        return _run_elementwise(kernel, x, self._packed)


class BitEstimatorPallas:
    """Fused stack of Bitparm layers (the usual BitEstimator: 3 non-final + 1 final).
    The whole chain runs in a single pallas_call, so x is DMA'd HBM->VMEM once and
    the result written back once, instead of one HBM round-trip per layer."""

    def __init__(self, channel, key, num_layers=4):
        keys = jax.random.split(key, num_layers)
        self.layers = [BitparmPallas(channel, keys[i], final=(i == num_layers - 1))
                       for i in range(num_layers)]
        self.channel = channel
        self.num_layers = num_layers
        rows = []
        for layer in self.layers:
            p = layer._packed
            if p.shape[0] == 2:  # final layer: pad the (unused) tanh(a) row
                p = jnp.concatenate([p, jnp.zeros((1, channel), jnp.float32)], axis=0)
            rows.append(p)
        self._packed = jnp.concatenate(rows, axis=0)   # (3 * num_layers, C)

    def __call__(self, x):
        kernel = functools.partial(_bitestimator_kernel, num_layers=self.num_layers)
        return _run_elementwise(kernel, x, self._packed)


# ----------------------------- reference + test ------------------------------

def _bitparm_reference(x, h, b, a=None, final=False, is_unimodal=False):
    """Pure-JAX reference matching the PyTorch forward."""
    sp = jax.nn.softplus(h)
    if final:
        return jax.nn.sigmoid(x * sp + b)
    aa = jnp.abs(a) if is_unimodal else a
    xt = x * sp + b
    return xt + jnp.tanh(xt) * jnp.tanh(aa)


if __name__ == "__main__":
    key = jax.random.PRNGKey(0)
    k_x1, k_x2, k_x3, k_p1, k_p2, k_p3, k_p4 = jax.random.split(key, 7)

    # 1) Non-final Bitparm, aligned f32 input (exercises multi-step parallel grid).
    N, C = 512, 128
    x = jax.random.normal(k_x1, (N, C), jnp.float32)
    m = BitparmPallas(C, k_p1, is_symmetric=False, is_unimodal=False, final=False)
    y = m(x)
    jax.block_until_ready(y)
    y_ref = _bitparm_reference(x, m.h, m.b, m.a, final=False)
    assert jnp.allclose(y, y_ref, atol=1e-5, rtol=1e-5), "non-final mismatch"

    # 2) Final Bitparm (sigmoid head, lowered to tanh inside the kernel).
    m_final = BitparmPallas(C, k_p2, final=True)
    y2 = m_final(x)
    jax.block_until_ready(y2)
    y2_ref = _bitparm_reference(x, m_final.h, m_final.b, final=True)
    assert jnp.allclose(y2, y2_ref, atol=1e-5, rtol=1e-5), "final mismatch"

    # 3) Ragged rows + channels not a multiple of 128 + is_unimodal.
    Nr, Cr = 100, 96
    xr = jax.random.normal(k_x2, (Nr, Cr), jnp.float32)
    mr = BitparmPallas(Cr, k_p3, is_unimodal=True)
    yr = mr(xr)
    jax.block_until_ready(yr)
    yr_ref = _bitparm_reference(xr, mr.h, mr.b, mr.a, is_unimodal=True)
    assert jnp.allclose(yr, yr_ref, atol=1e-5, rtol=1e-5), "ragged mismatch"

    # 4) Fused 4-layer BitEstimator stack (single HBM round-trip for the chain).
    est = BitEstimatorPallas(C, k_p4, num_layers=4)
    yf = est(x)
    jax.block_until_ready(yf)
    ref = x
    for layer in est.layers:
        ref = _bitparm_reference(ref, layer.h, layer.b, layer.a, final=layer.final)
    assert jnp.allclose(yf, ref, atol=1e-5, rtol=1e-5), "fused stack mismatch"

    # 5) bf16 streaming: halve HBM traffic; math stays f32 inside the kernel.
    xb = jax.random.normal(k_x3, (256, C), jnp.float32).astype(jnp.bfloat16)
    yb = m(xb)
    jax.block_until_ready(yb)
    yb_ref = _bitparm_reference(xb.astype(jnp.float32), m.h, m.b, m.a)
    assert yb.dtype == jnp.bfloat16
    assert jnp.allclose(yb.astype(jnp.float32), yb_ref, atol=5e-2, rtol=2e-2), \
        "bf16 mismatch"

    print("KERNEL_OK")
</pallas_src>

<mosaic_0001>
module attributes {stable_mosaic.version = 11 : i64} {
  func.func @_bitparm_kernel(%arg0: i32, %arg1: memref<128x128xf32, #tpu.memory_space<vmem>>, %arg2: memref<3x128xf32, #tpu.memory_space<vmem>>, %arg3: memref<128x128xf32, #tpu.memory_space<vmem>>) attributes {dimension_semantics = [#tpu.dimension_semantics<parallel>], iteration_bounds = array<i64: 4>, scalar_prefetch = 0 : i64, scratch_operands = 0 : i64, tpu.core_type = #tpu.core_type<tc>, window_params = [{transform_indices = @transform_0, window_bounds = array<i64: 128, 128>}, {pipeline_mode = #tpu.pipeline_mode<synchronous>, transform_indices = @transform_1, window_bounds = array<i64: 3, 128>}, {transform_indices = @transform_2, window_bounds = array<i64: 128, 128>}]} {
    %c0 = arith.constant 0 : index
    %c0_0 = arith.constant 0 : index
    %0 = vector.load %arg1[%c0, %c0_0] : memref<128x128xf32, #tpu.memory_space<vmem>>, vector<128x128xf32>
    %c0_1 = arith.constant 0 : index
    %c0_2 = arith.constant 0 : index
    %1 = vector.load %arg2[%c0_1, %c0_2] : memref<3x128xf32, #tpu.memory_space<vmem>>, vector<3x128xf32>
    %2 = vector.extract_strided_slice %1 {offsets = [0, 0], sizes = [1, 128], strides = [1, 1]} : vector<3x128xf32> to vector<1x128xf32>
    %3 = vector.extract_strided_slice %1 {offsets = [1, 0], sizes = [1, 128], strides = [1, 1]} : vector<3x128xf32> to vector<1x128xf32>
    %4 = vector.extract_strided_slice %1 {offsets = [2, 0], sizes = [1, 128], strides = [1, 1]} : vector<3x128xf32> to vector<1x128xf32>
    %5 = vector.broadcast %2 : vector<1x128xf32> to vector<128x128xf32>
    %6 = arith.mulf %0, %5 : vector<128x128xf32>
    %7 = vector.broadcast %3 : vector<1x128xf32> to vector<128x128xf32>
    %8 = arith.addf %6, %7 : vector<128x128xf32>
    %9 = math.tanh %8 : vector<128x128xf32>
    %10 = vector.broadcast %4 : vector<1x128xf32> to vector<128x128xf32>
    %11 = arith.mulf %9, %10 : vector<128x128xf32>
    %12 = arith.addf %8, %11 : vector<128x128xf32>
    %c0_3 = arith.constant 0 : index
    %c0_4 = arith.constant 0 : index
    %13 = vector.load %arg3[%c0_3, %c0_4] : memref<128x128xf32, #tpu.memory_space<vmem>>, vector<128x128xf32>
    tpu.vector_store %arg3[%c0_3, %c0_4], %12 {strides = array<i32>} : memref<128x128xf32, #tpu.memory_space<vmem>>, vector<128x128xf32>,
    return
  }
  func.func @transform_0(%arg0: i32) -> (i32, i32) {
    %c0_i32 = arith.constant 0 : i32
    %c0_i32_0 = arith.constant 0 : i32
    return %arg0, %c0_i32 : i32, i32
  }
  func.func @transform_1(%arg0: i32) -> (i32, i32) {
    %c0_i32 = arith.constant 0 : i32
    %c0_i32_0 = arith.constant 0 : i32
    %c0_i32_1 = arith.constant 0 : i32
    return %c0_i32, %c0_i32_0 : i32, i32
  }
  func.func @transform_2(%arg0: i32) -> (i32, i32) {
    %c0_i32 = arith.constant 0 : i32
    %c0_i32_0 = arith.constant 0 : i32
    return %arg0, %c0_i32 : i32, i32
  }
}

</mosaic_0001>

<bundles_post_ra>
// kernel: tpu_custom_call.1
= control target key start
LH: loop header
LB: loop body
LE: loop exit
PB: predicated region body
PF: predicated region fallthrough
CT: control target
= control target key end

     0   :  { %7 = vsyncpa [#allocation3], 0  ;;  %s987_s0 = inlined_call_operand.hbm [shape: f32[512,128], index: 0, kind: input, shape index: {}]   ;;  %s988_s1 = inlined_call_operand.hbm [shape: f32[3,128], index: 1, kind: input, shape index: {}]   ;;  %s989_s2 = inlined_call_operand.hbm [shape: f32[512,128], index: 2, kind: output, shape index: {}]  }
   0x1   :  { %9 = vsyncpa [#allocation3 + $0x1], 0 }
   0x2   :  { %10 = vsyncpa [#allocation6], 0 }
   0x3   :  { %11 = vsyncpa [#allocation4], 0 }
   0x4   :  { %13 = vsyncpa [#allocation4 + $0x1], 0  ;;  %s662_s9 = smov 0   ;;  %s664_s10 = smov 0  }
   0x5   :  { %s666_s11 = smov 0   ;;  %s668_s12 = smov 0  }
   0x6 LB: > { %s683_s13 = sadd.s32 4294967295, %s638_s12   ;;  %s399_s14 = sadd.s32 4294967294, %s638_s12   ;;  %s638_s12 = sphi %s668_s12, %s1012_s12   ;;  %s634_s11 = sphi %s666_s11, %s1011_s11   ;;  %s630_s10 = sphi %s664_s10, %s1010_s10   ;;  %s626_s9 = sphi %s662_s9, %s1009_s9  }
   0x7   : > { %s687_s15 = sadd.s32 1, %s638_s12   ;;  %s26_s16 = sadd.s32 1, %s634_s11 }
   0x8   : > { %s23_s17 = ssub.s32 %s638_s12, %s687_s15  ;;  %p33_p0 = scmp.ne.s32.totalorder %s634_s11, %s630_s10 }
   0x9   : > { %p24_p1 = scmp.eq.s32.totalorder %s23_s17, 0  ;;  %p34_p2 = scmp.eq.s32.totalorder %s638_s12, 0 }
   0xa   : > { %p39_p3 = scmp.ne.s32.totalorder %s630_s10, %s626_s9  ;;  %p990_p4 = scmp.eq.s32.totalorder %s683_s13, 0 }
   0xb   : > { %s699_s18 = scalar_select %p24_p1, %s634_s11, %s26_s16  }
   0xc   : > { %p701_p5 = por %p34_p2, %p33_p0  ;;  %p707_p6 = por %p990_p4, %p39_p3 }
   0xd   : > { %p84_p7 = scmp.eq.s32.totalorder %s683_s13, 3  ;;  %p90_p8 = scmp.eq.s32.totalorder %s399_s14, 3 }
   0xe   : > { %s996_s20 = scalar_select %p707_p6, 1, 0 }
   0xf   : > { %p400_p9 = scmp.ge.s32.totalorder %s638_s12, 1  ;;  %p97_p10 = scmp.lt.s32.totalorder %s638_s12, 5 }
  0x10   : > { %p714_p11 = por %p84_p7, %p33_p0  ;;  %p718_p12 = por %p90_p8, %p39_p3 }
  0x11   : > { %p722_p13 = pnand %p400_p9, %p97_p10  ;;  %s640_s24 = smov [#allocation5]  }
  0x12   : > { %s997_s21 = scalar_select %p714_p11, 1, 0 }
  0x13   : > { %s998_s22 = scalar_select %p718_p12, 1, 0 }
  0x14   : > { %s999_s23 = scalar_select %p722_p13, 1, 0 }
  0x15   : > { %p425_p1 = pneg %p722_p13  ;;  %s110_s25 = sshll.u32 %s640_s24, 4  ;;  %s111_s25 = int_to_ptr.vmem [resolvable:$true] %s110_s25 }
  0x16   : > { %p438_p2 = scmp.lt.s32.totalorder %s638_s12, 4  ;;  %s121_s27 = sand.u32 1, %s634_s11  }
  0x17   : > { %p731_p0 = pnand %p425_p1, %p990_p4  ;;  %s403_s29 = sshll.u32 %s121_s27, 7 }
  0x18   : > { %p738_p3 = pnand %p438_p2, %p701_p5  ;;  %s510_s4 = scalar_lea.hbm %s988_s1, 64 }
  0x19   : > { %p511_p7 = scmp.ne.s32.totalorder %s988_s1, %s510_s4  ;;  %p512_p8 = pneg %p731_p0 }
  0x1a   : > { %s1001_s28 = scalar_select %p738_p3, 1, 0 }
  0x1b   : > { %p513_p9 = pnand %p512_p8, %p511_p7  ;;  %p517_p5 = scmp.lt.u32.totalorder %s510_s4, %s988_s1 }
  0x1d   : > { %p514_p10 = pneg %p513_p9 }
  0x1f   : > { %p519_p1 = pnand %p517_p5, %p514_p10 }
  0x21   : > { %522 = shalt.err (!%p519_p1)
}
  0x22   : > { %s523_s14 = scalar_lea.vmem %s111_s25, 64  ;;  %p531_p11 = scmp.lt.s32.totalorder %s111_s25, %s111_s25 }
  0x23   : > { %p524_p2 = scmp.ne.s32.totalorder %s111_s25, %s523_s14  ;;  %p532_p6 = scmp.lt.s32.totalorder %s523_s14, %s523_s14 }
  0x25   : > { %p526_p4 = pnand %p524_p2, %p512_p8  ;;  %p533_p13 = por %p532_p6, %p531_p11 }
  0x27   : > { %p527_p12 = pneg %p526_p4 }
  0x29   : > { %p534_p3 = pnand %p533_p13, %p527_p12 }
  0x2b   : > { %537 = shalt.err (!%p534_p3)
}
  0x2c   : > { %428 = dma.hbm_to_vmem [thread:$0]  (!%p731_p0), %s988_s1, 64, %s111_s25, [#allocation6]  }
  0x2d   : > { %s415_s19 = sshll.u32 %s638_s12, 11  ;;  %s125_s24 = scalar_lea.vmem [#allocation2], %s403_s29 }
  0x2e   : > { %s132_s30 = sshll.u32 %s125_s24, 4  ;;  %s762_s5 = scalar_lea.hbm %s987_s0, %s415_s19  ;;  %s764_s30 = int_to_ptr.vmem [resolvable:$true] %s132_s30 }
  0x2f   : > { %s766_s26 = scalar_lea.sflag [#allocation3], %s121_s27  ;;  %s538_s6 = scalar_lea.hbm %s762_s5, 2048 }
  0x30   : > { %p539_p4 = scmp.ne.s32.totalorder %s762_s5, %s538_s6  ;;  %p1002_p6 = scmp.ne.s32.totalorder %s1001_s28, 0 }
  0x31   : > { %s543_s7 = scalar_lea.hbm %s987_s0, 8192  ;;  %p544_p0 = scmp.lt.u32.totalorder %s762_s5, %s987_s0 }
  0x32   : > { %p540_p11 = pneg %p1002_p6  ;;  %p545_p3 = scmp.lt.u32.totalorder %s543_s7, %s538_s6 }
  0x33   : > { %p547_p8 = scmp.lt.u32.totalorder %s538_s6, %s762_s5 }
  0x34   : > { %p541_p12 = pnand %p540_p11, %p539_p4  ;;  %p546_p7 = por %p545_p3, %p544_p0 }
  0x36   : > { %p542_p13 = pneg %p541_p12  ;;  %p548_p9 = por %p547_p8, %p546_p7 }
  0x38   : > { %p549_p10 = pnand %p548_p9, %p542_p13 }
  0x3a   : > { %552 = shalt.err (!%p549_p10)
}
  0x3b   : > { %s553_s27 = scalar_lea.vmem %s764_s30, 2048  ;;  %s641_s16 = smov [#allocation2]  }
  0x3c   : > { %p554_p5 = scmp.ne.s32.totalorder %s764_s30, %s553_s27  ;;  %s558_s17 = sshll.u32 %s641_s16, 4  ;;  %s559_s17 = int_to_ptr.vmem [resolvable:$false] %s558_s17 }
  0x3d   : > { %s560_s19 = scalar_lea.vmem %s559_s17, 4096  ;;  %p561_p4 = scmp.lt.s32.totalorder %s764_s30, %s559_s17 }
  0x3e   : > { %p556_p1 = pnand %p554_p5, %p540_p11  ;;  %p562_p12 = scmp.lt.s32.totalorder %s560_s19, %s553_s27 }
  0x40   : > { %p557_p2 = pneg %p556_p1  ;;  %p563_p0 = por %p562_p12, %p561_p4 }
  0x42   : > { %p564_p3 = pnand %p563_p0, %p557_p2 }
  0x44   : > { %567 = shalt.err (!%p564_p3)
}
  0x45   : > { %s642_s24 = smov 128   ;;  %s643_s3 = smov 8  }
  0x46   : > { %432 = dma.hbm_to_vmem [thread:$0]  (!%p1002_p6), %s762_s5, 2048, %s764_s30, %s766_s26, %s642_s24, %s642_s24, %s643_s3  }
  0x47   : > { %p1003_p11 = scmp.ne.s32.totalorder %s999_s23, 0 }
  0x48   : > { %s797_s4 = sand.u32 (!%p1003_p11), 1, %s630_s10   ;;  %p1004_p13 = scmp.ne.s32.totalorder (!%p1003_p11), %s996_s20, 0 }
  0x49   : > { %144 = sbr.rel (%p1003_p11) target bundleno = 141 (0x8d), region = 28  ;;  %s407_s6 = sshll.u32 (!%p1003_p11), %s797_s4, 7 }
  0x4a   : > { %s147_s25 = scalar_lea.sflag (!%p1003_p11), [#allocation3], %s797_s4  ;;  %s803_s29 = scalar_lea.vmem (!%p1003_p11), [#allocation2], %s407_s6 }
  0x50   : > { %613 = dma.done.wait (%p1004_p13), %s147_s25, 2048  }
  0x51   : > { %615 = vsyncadd (%p1004_p13), %s147_s25, 4294965248  ;;  %p1005_p6 = scmp.eq.s32.totalorder %s683_s13, 0 }
  0x53   : > { %617 = dma.done.wait (%p1005_p6), [#allocation6], 64   ;;  %p1006_p7 = pmov %p1005_p6 }
  0x54   : > { %v194_v0 = vlaneseq  ;;  %v177_v4 = vld [vmem:[%s803_s29] sm:$0xff]  ;;  %v178_v6 = vld [vmem:[%s803_s29 + $0x8] sm:$0xff]  ;;  %v179_v9 = vld [vmem:[%s803_s29 + $0x10] sm:$0xff]  ;;  %s893_s20 = scalar_lea.vmem [#allocation7], %s407_s6  ;;  %s416_s23 = sshll.u32 %s683_s13, 11 }
  0x55   : > { %619 = vsyncadd (%p1006_p7), [#allocation6], 4294967232  ;;  %v193_v5 = vld [vmem:[#allocation5] sm:$0x7]  ;;  %v180_v10 = vld [vmem:[%s803_s29 + $0x18] sm:$0xff]  ;;  %s316_s28 = sshll.u32 %s893_s20, 4  ;;  %s938_s5 = scalar_lea.hbm %s989_s2, %s416_s23  ;;  %s940_s28 = int_to_ptr.vmem [resolvable:$true] %s316_s28 }
  0x56   : > { %v195_v1 = vshrl.u32 %v194_v0, 7  ;;  %v181_v11 = vld [vmem:[%s803_s29 + $0x20] sm:$0xff]  ;;  %v182_v12 = vld [vmem:[%s803_s29 + $0x28] sm:$0xff]  ;;  %v183_v13 = vld [vmem:[%s803_s29 + $0x30] sm:$0xff]  ;;  %s303_s26 = scalar_lea.sflag [#allocation4], %s797_s4  ;;  %s568_s7 = scalar_lea.vmem %s940_s28, 2048 }
  0x57   : > { %v184_v18 = vld [vmem:[%s803_s29 + $0x38] sm:$0xff]  ;;  %v185_v21 = vld [vmem:[%s803_s29 + $0x40] sm:$0xff]  ;;  %v186_v26 = vld [vmem:[%s803_s29 + $0x48] sm:$0xff]  ;;  %p569_p8 = scmp.ne.s32.totalorder %s940_s28, %s568_s7  ;;  %p1007_p9 = scmp.ne.s32.totalorder %s997_s21, 0 }
  0x58   : > { %v196_v2 = vsub.s32 0, %v195_v1  ;;  %v216_v3 = vsub.s32 1, %v195_v1  ;;  %v187_v29 = vld [vmem:[%s803_s29 + $0x50] sm:$0xff]  ;;  %v188_v32 = vld [vmem:[%s803_s29 + $0x58] sm:$0xff]  ;;  %v189_v35 = vld [vmem:[%s803_s29 + $0x60] sm:$0xff]  ;;  %v252_v39 = vsub.s32 2, %v195_v1 }
  0x59   : > { %v190_v38 = vld [vmem:[%s803_s29 + $0x68] sm:$0xff]  ;;  %v191_v42 = vld [vmem:[%s803_s29 + $0x70] sm:$0xff]  ;;  %v192_v45 = vld [vmem:[%s803_s29 + $0x78] sm:$0xff]  ;;  %p570_p10 = pnand %p569_p8, %p1007_p9  ;;  %s644_s8 = smov [#allocation7]  }
  0x5a   : > { %v197_v7 = vrot.slane %v193_v5, %v196_v2  ;;  %v815_v8 = vrot.slane %v193_v5, %v216_v3  ;;  %v862_v50 = vrot.slane %v193_v5, %v252_v39  ;;  %s572_s14 = sshll.u32 %s644_s8, 4  ;;  %s573_s14 = int_to_ptr.vmem [resolvable:$false] %s572_s14 }
  0x5b   : > { %p571_p5 = pneg %p570_p10  ;;  %s574_s27 = scalar_lea.vmem %s573_s14, 4096 }
  0x5c   : > { %v198_v14 = vmul.f32 %v197_v7, %v177_v4  ;;  %v199_v15 = vmul.f32 %v197_v7, %v178_v6  ;;  %v200_v16 = vmul.f32 %v197_v7, %v179_v9  ;;  %v201_v17 = vmul.f32 %v197_v7, %v180_v10  ;;  %p575_p1 = scmp.lt.s32.totalorder %s940_s28, %s573_s14  ;;  %p576_p2 = scmp.lt.s32.totalorder %s574_s27, %s568_s7 }
  0x5d   : > { %v202_v19 = vmul.f32 %v197_v7, %v181_v11  ;;  %v203_v20 = vmul.f32 %v197_v7, %v182_v12  ;;  %v204_v25 = vmul.f32 %v197_v7, %v183_v13  ;;  %v205_v28 = vmul.f32 %v197_v7, %v184_v18 }
  0x5e   : > { %v218_v22 = vadd.f32 %v815_v8, %v198_v14  ;;  %v219_v23 = vadd.f32 %v815_v8, %v199_v15  ;;  %v220_v24 = vadd.f32 %v815_v8, %v200_v16  ;;  %v829_v27 = vadd.f32 %v815_v8, %v201_v17  ;;  %p577_p4 = por %p576_p2, %p575_p1 }
  0x5f   : > { %v833_v30 = vadd.f32 %v815_v8, %v202_v19  ;;  %v206_v31 = vmul.f32 %v197_v7, %v185_v21  ;;  %v837_v33 = vadd.f32 %v815_v8, %v203_v20  ;;  %v207_v34 = vmul.f32 %v197_v7, %v186_v26 }
  0x60   : > { %478 = vtanh.f32 %v218_v22  ;;  %v841_v36 = vadd.f32 %v815_v8, %v204_v25  ;;  %v208_v37 = vmul.f32 %v197_v7, %v187_v29  ;;  %v846_v40 = vadd.f32 %v815_v8, %v205_v28  ;;  %p578_p12 = pnand %p577_p4, %p571_p5 }
  0x61   : > { %480 = vtanh.f32 %v219_v23  ;;  %v209_v41 = vmul.f32 %v197_v7, %v188_v32  ;;  %v851_v43 = vadd.f32 %v815_v8, %v206_v31  ;;  %v210_v44 = vmul.f32 %v197_v7, %v189_v35 }
  0x62   : > { %482 = vtanh.f32 %v220_v24  ;;  %v856_v46 = vadd.f32 %v815_v8, %v207_v34  ;;  %v211_v47 = vmul.f32 %v197_v7, %v190_v38  ;;  %v860_v48 = vadd.f32 %v815_v8, %v208_v37 }
  0x63   : > { %484 = vtanh.f32 %v829_v27  ;;  %v212_v49 = vmul.f32 %v197_v7, %v191_v42  ;;  %v866_v51 = vadd.f32 %v815_v8, %v209_v41  ;;  %v213_v52 = vmul.f32 %v197_v7, %v192_v45 }
  0x64   : > { %486 = vtanh.f32 %v833_v30  ;;  %v870_v53 = vadd.f32 %v815_v8, %v210_v44  ;;  %v874_v54 = vadd.f32 %v815_v8, %v211_v47 }
  0x65   : > { %488 = vtanh.f32 %v837_v33  ;;  %v878_v56 = vadd.f32 %v815_v8, %v212_v49  ;;  %v883_v59 = vadd.f32 %v815_v8, %v213_v52 }
  0x66   : > { %490 = vtanh.f32 %v841_v36 }
  0x67   : > { %492 = vtanh.f32 %v846_v40 }
  0x68   : > { %494 = vtanh.f32 %v851_v43 }
  0x69   : > { %496 = vtanh.f32 %v856_v46 }
  0x6a   : > { %v479_v55 = vpop.eup %478  ;;  %498 = vtanh.f32 %v860_v48 }
  0x6b   : > { %v481_v57 = vpop.eup %480  ;;  %v254_v58 = vmul.f32 %v479_v55, %v862_v50  ;;  %500 = vtanh.f32 %v866_v51 }
  0x6c   : > { %v483_v60 = vpop.eup %482  ;;  %v255_v61 = vmul.f32 %v481_v57, %v862_v50  ;;  %502 = vtanh.f32 %v870_v53 }
  0x6d   : > { %v485_v62 = vpop.eup %484  ;;  %v270_v63 = vadd.f32 %v254_v58, %v218_v22  ;;  %v256_v0 = vmul.f32 %v483_v60, %v862_v50  ;;  %504 = vtanh.f32 %v874_v54 }
  0x6e   : > { %v487_v1 = vpop.eup %486  ;;  %v271_v2 = vadd.f32 %v255_v61, %v219_v23  ;;  %v257_v3 = vmul.f32 %v485_v62, %v862_v50  ;;  %506 = vtanh.f32 %v878_v56 }
  0x6f   : > { %v489_v4 = vpop.eup %488  ;;  %286 = vst [vmem:[%s893_s20] sm:$0xff] %v270_v63  ;;  %v272_v5 = vadd.f32 %v256_v0, %v220_v24  ;;  %v258_v6 = vmul.f32 %v487_v1, %v862_v50  ;;  %508 = vtanh.f32 %v883_v59 }
  0x70   : > { %v491_v7 = vpop.eup %490  ;;  %287 = vst [vmem:[%s893_s20 + $0x8] sm:$0xff] %v271_v2  ;;  %v273_v8 = vadd.f32 %v257_v3, %v829_v27  ;;  %v259_v9 = vmul.f32 %v489_v4, %v862_v50 }
  0x71   : > { %v493_v10 = vpop.eup %492  ;;  %288 = vst [vmem:[%s893_s20 + $0x10] sm:$0xff] %v272_v5  ;;  %v274_v11 = vadd.f32 %v258_v6, %v833_v30  ;;  %v260_v12 = vmul.f32 %v491_v7, %v862_v50 }
  0x72   : > { %v495_v13 = vpop.eup %494  ;;  %289 = vst [vmem:[%s893_s20 + $0x18] sm:$0xff] %v273_v8  ;;  %v275_v14 = vadd.f32 %v259_v9, %v837_v33  ;;  %v261_v15 = vmul.f32 %v493_v10, %v862_v50 }
  0x73   : > { %v497_v16 = vpop.eup %496  ;;  %290 = vst [vmem:[%s893_s20 + $0x20] sm:$0xff] %v274_v11  ;;  %v276_v17 = vadd.f32 %v260_v12, %v841_v36  ;;  %v262_v18 = vmul.f32 %v495_v13, %v862_v50 }
  0x74   : > { %v499_v19 = vpop.eup %498  ;;  %291 = vst [vmem:[%s893_s20 + $0x28] sm:$0xff] %v275_v14  ;;  %v277_v20 = vadd.f32 %v261_v15, %v846_v40  ;;  %v263_v21 = vmul.f32 %v497_v16, %v862_v50 }
  0x75   : > { %v501_v22 = vpop.eup %500  ;;  %292 = vst [vmem:[%s893_s20 + $0x30] sm:$0xff] %v276_v17  ;;  %v278_v23 = vadd.f32 %v262_v18, %v851_v43  ;;  %v264_v24 = vmul.f32 %v499_v19, %v862_v50 }
  0x76   : > { %v503_v25 = vpop.eup %502  ;;  %293 = vst [vmem:[%s893_s20 + $0x38] sm:$0xff] %v277_v20  ;;  %v279_v26 = vadd.f32 %v263_v21, %v856_v46  ;;  %v265_v27 = vmul.f32 %v501_v22, %v862_v50 }
  0x77   : > { %v505_v28 = vpop.eup %504  ;;  %294 = vst [vmem:[%s893_s20 + $0x40] sm:$0xff] %v278_v23  ;;  %v280_v29 = vadd.f32 %v264_v24, %v860_v48  ;;  %v266_v30 = vmul.f32 %v503_v25, %v862_v50 }
  0x78   : > { %v507_v31 = vpop.eup %506  ;;  %295 = vst [vmem:[%s893_s20 + $0x48] sm:$0xff] %v279_v26  ;;  %v281_v32 = vadd.f32 %v265_v27, %v866_v51  ;;  %v267_v33 = vmul.f32 %v505_v28, %v862_v50 }
  0x79   : > { %v509_v34 = vpop.eup %508  ;;  %296 = vst [vmem:[%s893_s20 + $0x50] sm:$0xff] %v280_v29  ;;  %v282_v35 = vadd.f32 %v266_v30, %v870_v53  ;;  %v268_v36 = vmul.f32 %v507_v31, %v862_v50 }
  0x7a   : > { %297 = vst [vmem:[%s893_s20 + $0x58] sm:$0xff] %v281_v32  ;;  %v283_v37 = vadd.f32 %v267_v33, %v874_v54  ;;  %v269_v38 = vmul.f32 %v509_v34, %v862_v50 }
  0x7b   : > { %298 = vst [vmem:[%s893_s20 + $0x60] sm:$0xff] %v282_v35  ;;  %v284_v39 = vadd.f32 %v268_v36, %v878_v56 }
  0x7c   : > { %299 = vst [vmem:[%s893_s20 + $0x68] sm:$0xff] %v283_v37  ;;  %v285_v40 = vadd.f32 %v269_v38, %v883_v59 }
  0x7d   : > { %300 = vst [vmem:[%s893_s20 + $0x70] sm:$0xff] %v284_v39 }
  0x7e   : > { %301 = vst [vmem:[%s893_s20 + $0x78] sm:$0xff] %v285_v40 }
  0x7f   : > { %581 = shalt.err (!%p578_p12)
}
  0x80   : > { %s582_s16 = scalar_lea.hbm %s938_s5, 2048  ;;  %s586_s24 = scalar_lea.hbm %s989_s2, 8192 }
  0x81   : > { %p583_p0 = scmp.ne.s32.totalorder %s938_s5, %s582_s16  ;;  %p587_p13 = scmp.lt.u32.totalorder %s938_s5, %s989_s2 }
  0x82   : > { %p588_p6 = scmp.lt.u32.totalorder %s586_s24, %s582_s16  ;;  %p590_p8 = scmp.lt.u32.totalorder %s582_s16, %s938_s5 }
  0x83   : > { %p584_p3 = pnand %p583_p0, %p1007_p9 }
  0x84   : > { %p589_p7 = por %p588_p6, %p587_p13 }
  0x85   : > { %p585_p11 = pneg %p584_p3 }
  0x86   : > { %p591_p10 = por %p590_p8, %p589_p7 }
  0x88   : > { %p592_p5 = pnand %p591_p10, %p585_p11 }
  0x8a   : > { %595 = shalt.err (!%p592_p5)
}
  0x8b   : > { %s645_s25 = smov 128   ;;  %s646_s29 = smov 8  }
  0x8c   : > { %423 = dma.vmem_to_hbm [thread:$0]  (%p1007_p9), %s940_s28, 2048, %s938_s5, %s303_s26, %s645_s25, %s645_s25, %s646_s29  }
  0x8d PF: > { %p440_p1 = scmp.ge.s32.totalorder %s638_s12, 2  ;;  %s331_s20 = sand.u32 1, %s626_s9  }
  0x8e   : > { %p1008_p2 = scmp.ne.s32.totalorder %s998_s22, 0  ;;  %s332_s23 = scalar_lea.sflag [#allocation4], %s331_s20 }
  0x90   : > { %p434_p4 = pnand %p440_p1, %p1008_p2 }
  0x92   : > { %621 = dma.done.wait (!%p434_p4), %s332_s23, 2048  }
  0x93   : > { %623 = vsyncadd (!%p434_p4), %s332_s23, 4294965248  ;;  %p16_p12 = scmp.ge.s32.totalorder %s687_s15, 6   ;;  %s1009_s9 = smov %s630_s10 }
  0x94   : > { %s1010_s10 = smov %s634_s11  ;;  %s1011_s11 = smov %s699_s18 }
  0x95   : > { %s1012_s12 = smov %s687_s15  ;;  %18 = sbr.rel (!%p16_p12) target bundleno = 6 (0x6), region = 77 }
  0x9c   :  { %337 = vsyncpa [#allocation3], 1 }
  0x9d   :  { %339 = vsyncpa [#allocation3 + $0x1], 1 }
  0x9e   :  { %340 = vsyncpa [#allocation6], 1 }
  0x9f   :  { %341 = vsyncpa [#allocation4], 1 }
  0xa0   :  { %343 = vsyncpa [#allocation4 + $0x1], 1 }

</bundles_post_ra>
